<compile_context>
chip_gen: v6e
topology: v6e:2x2x1
jax: 0.10.0
libtpu: 0.0.40
codegen_flags: <defaults>
</compile_context>

<pallas_src>
import functools

import jax
import jax.numpy as jnp
from jax.experimental import pallas as pl
from jax.experimental.pallas import tpu as pltpu


def _si_enc_kernel(hidden,
                   x_hbm_ref, adj_ref, w_ref, b_ref,
                   out_ref,
                   x_scratch, bias_scratch, copy_sem):
    """One grid step == one (GATConv + Linear + ReLU) layer; x stays in VMEM."""
    layer = pl.program_id(0)
    n_layer = pl.num_programs(0)

    # Layer 0: DMA the (padded) input features HBM -> persistent VMEM scratch,
    # and expand the int8 adjacency once into an additive f32 softmax bias.
    @pl.when(layer == 0)
    def _():
        cp = pltpu.make_async_copy(x_hbm_ref, x_scratch, copy_sem)
        cp.start()
        adj_f = adj_ref[...].astype(jnp.float32)                       # [N, N]
        bias_scratch[...] = jnp.where(adj_f > 0.0,
                                      jnp.float32(0.0), jnp.float32(-1e30))
        cp.wait()

    x = x_scratch[...]                                                 # [N, F_pad]

    # ---- single fused MXU pass: features + both attention projections ----
    # y = x @ [W_gat | W_lin | W_gat@att_dst^T | W_gat@att_src^T]
    y = jnp.dot(x, w_ref[...], preferred_element_type=jnp.float32)    # [N, 2H+2] f32
    h = y[:, :hidden]                                                  # GAT branch   [N, H]
    lin = y[:, hidden:2 * hidden]                                      # Linear branch[N, H]
    a_dst = y[:, 2 * hidden:2 * hidden + 1]                            # [N, 1]
    a_src = y[:, 2 * hidden + 1:2 * hidden + 2].T                      # [1, N] (XLU transpose)

    # ---- masked softmax over incoming edges (rows = dst nodes) ----
    e = a_dst + a_src                                                  # [N, N]
    e = jnp.where(e > 0, e, 0.2 * e)                                   # leaky_relu(0.2)
    z = e + bias_scratch[...]                                          # single VPU add mask
    m = jnp.max(z, axis=-1, keepdims=True)                             # row max over edges
    m_safe = jnp.where(m > -5e29, m, 0.0)                              # rows w/o edges: shift by 0
    p = jnp.exp(z - m_safe)                                            # non-edges underflow to 0 exactly
    denom = jnp.sum(p, axis=-1, keepdims=True)                         # [N, 1]
    d = jnp.where(denom > 0, denom, 1.0)
    inv = pl.reciprocal(d, approx=True)                                # EUP vrcp (free slot)
    inv = inv * (2.0 - d * inv)                                        # one Newton step -> ~f32 accuracy

    # Normalize AFTER aggregation.  p/h are cast to the MXU dtype only here,
    # keeping the softmax math in f32 (exact-zero / max-shift guarantees).
    gat = jnp.dot(p.astype(x_scratch.dtype), h.astype(x_scratch.dtype),
                  preferred_element_type=jnp.float32) * inv            # [N, H]
    new_x = jnp.maximum(gat + lin + b_ref[...], 0.0)                   # relu(gat + b_gat + lin + b_lin)

    # Keep features resident for the next layer.  Columns >= H (if any) keep
    # stale values but multiply zero-padded weight rows, so they are harmless.
    x_scratch[:, :hidden] = new_x.astype(x_scratch.dtype)

    # Only the last layer leaves VMEM.
    @pl.when(layer == n_layer - 1)
    def _():
        out_ref[...] = new_x


def si_enc_forward(x, adj, params, mxu_dtype=jnp.float32):
    """x: [N, in_dim]; adj: [N, N] int8/bool with adj[dst, src] != 0 iff edge src->dst.
    params: list of (w_gat[f_in,H], att_src[1,H], att_dst[1,H], b_gat[1,H], w_lin[f_in,H], b_lin[1,H]).
    mxu_dtype: use jnp.bfloat16 when scaling N/H (halves VMEM for p and MXU passes);
               f32 at demo size so the kernel matches the f32 reference tightly."""
    n_layer = len(params)
    n, in_dim = x.shape
    hidden = params[0][0].shape[1]
    f_pad = max(in_dim, hidden)
    wcols = 2 * hidden + 2

    # ---- wrapper-side weight packing (plain JAX glue, done once) ----
    w_l, b_l = [], []
    for (w_gat, att_src, att_dst, b_gat, w_lin, b_lin) in params:
        w_gat = w_gat.astype(jnp.float32)
        w_lin = w_lin.astype(jnp.float32)
        # Fold attention projections into the packed weight:
        #   [W_gat | W_lin | W_gat @ att_dst^T | W_gat @ att_src^T]
        w = jnp.concatenate(
            [w_gat, w_lin,
             w_gat @ att_dst.astype(jnp.float32).T,
             w_gat @ att_src.astype(jnp.float32).T], axis=1)          # [f_in, 2H+2]
        if w.shape[0] < f_pad:
            # zero rows: stale x_scratch columns beyond this layer's f_in contribute nothing
            w = jnp.pad(w, ((0, f_pad - w.shape[0]), (0, 0)))
        w_l.append(w)
        b_l.append((b_gat + b_lin).astype(jnp.float32))               # [1, H]
    w_cat = jnp.stack(w_l).astype(mxu_dtype)   # [L, F_pad, 2H+2]
    b_sum = jnp.stack(b_l)                     # [L, 1, H] f32

    x = x.astype(mxu_dtype)
    if in_dim < f_pad:
        x = jnp.pad(x, ((0, 0), (0, f_pad - in_dim)))
    adj = adj.astype(jnp.int8)                 # 4x less HBM traffic than f32

    kernel = functools.partial(_si_enc_kernel, hidden)
    grid_spec = pltpu.PrefetchScalarGridSpec(
        num_scalar_prefetch=0,
        grid=(n_layer,),
        in_specs=[
            pl.BlockSpec(memory_space=pl.ANY),                        # x stays in HBM; DMA'd once
            pl.BlockSpec((n, n), lambda l: (0, 0)),                   # adj int8, fetched once
            pl.BlockSpec((None, f_pad, wcols), lambda l: (l, 0, 0)),  # packed per-layer weights
            pl.BlockSpec((None, 1, hidden), lambda l: (l, 0, 0)),     # b_gat + b_lin per layer
        ],
        out_specs=pl.BlockSpec((n, hidden), lambda l: (0, 0)),
        scratch_shapes=[
            pltpu.VMEM((n, f_pad), mxu_dtype),       # x resident across layers
            pltpu.VMEM((n, n), jnp.float32),         # additive softmax bias (0 / -1e30)
            pltpu.SemaphoreType.DMA(()),             # layer-0 x copy
        ],
    )
    return pl.pallas_call(
        kernel,
        out_shape=jax.ShapeDtypeStruct((n, hidden), jnp.float32),
        grid_spec=grid_spec,
        compiler_params=pltpu.CompilerParams(
            dimension_semantics=("arbitrary",)),     # layers are sequential (output revisited)
    )(x, adj, w_cat, b_sum)


# Pure-JAX reference (same math as the PyTorch module) for a correctness check.
def si_enc_reference(x, adj, params):
    x = x.astype(jnp.float32)
    mask = adj > 0
    for (w_gat, att_src, att_dst, b_gat, w_lin, b_lin) in params:
        h = x @ w_gat
        a_dst = jnp.sum(h * att_dst, axis=-1, keepdims=True)
        a_src = jnp.sum(h * att_src, axis=-1, keepdims=True).T
        e = a_dst + a_src
        e = jnp.where(e > 0, e, 0.2 * e)
        z = jnp.where(mask, e, -jnp.inf)
        m = jnp.max(z, axis=-1, keepdims=True)
        m_safe = jnp.where(jnp.isfinite(m), m, 0.0)
        p = jnp.where(mask, jnp.exp(e - m_safe), 0.0)
        denom = jnp.sum(p, axis=-1, keepdims=True)
        attn = p / jnp.where(denom > 0, denom, 1.0)
        gat = attn @ h + b_gat
        lin = x @ w_lin + b_lin
        x = jnp.maximum(gat + lin, 0.0)
    return x


def init_params(key, n_layer, in_dim, hidden):
    params = []
    f_in = in_dim
    for _ in range(n_layer):
        key, k1, k2, k3, k4 = jax.random.split(key, 5)
        glorot_w = (6.0 / (f_in + hidden)) ** 0.5
        glorot_a = (6.0 / (1 + hidden)) ** 0.5
        w_gat = jax.random.uniform(k1, (f_in, hidden), jnp.float32, -glorot_w, glorot_w)
        att_src = jax.random.uniform(k2, (1, hidden), jnp.float32, -glorot_a, glorot_a)
        att_dst = jax.random.uniform(k3, (1, hidden), jnp.float32, -glorot_a, glorot_a)
        b_gat = jnp.zeros((1, hidden), jnp.float32)
        w_lin = jax.random.uniform(k4, (f_in, hidden), jnp.float32, -glorot_w, glorot_w)
        b_lin = jnp.zeros((1, hidden), jnp.float32)
        params.append((w_gat, att_src, att_dst, b_gat, w_lin, b_lin))
        f_in = hidden
    return params


if __name__ == "__main__":
    N_NODES = 16      # number of graph nodes
    IN_DIM = 32       # input feature dim
    HIDDEN = 32       # hidden_channels
    N_LAYER = 2       # args.n_layer
    N_EDGES = 48

    key = jax.random.PRNGKey(0)
    kx, ksrc, kdst, kp = jax.random.split(key, 4)

    x = jax.random.normal(kx, (N_NODES, IN_DIM), jnp.float32)

    # edge_index: [2, E] with row 0 = source nodes, row 1 = destination nodes.
    src = jax.random.randint(ksrc, (N_EDGES,), 0, N_NODES)
    dst = jax.random.randint(kdst, (N_EDGES,), 0, N_NODES)
    edge_index = jnp.stack([src, dst], axis=0)

    # Densify edge_index into an int8 adjacency mask adj[dst, src] = 1 (glue, plain JAX).
    adj = jnp.zeros((N_NODES, N_NODES), jnp.int8).at[edge_index[1], edge_index[0]].set(1)

    params = init_params(kp, N_LAYER, IN_DIM, HIDDEN)

    out = jax.block_until_ready(si_enc_forward(x, adj, params))

    ref = si_enc_reference(x, adj, params)
    assert out.shape == (N_NODES, HIDDEN)
    assert jnp.allclose(out, ref, atol=5e-4, rtol=5e-4), "kernel mismatch vs reference"

    print("KERNEL_OK")
</pallas_src>

<mosaic_0001>
module attributes {stable_mosaic.version = 11 : i64} {
  func.func @_si_enc_kernel(%arg0: i32, %arg1: memref<16x32xf32, #tpu.memory_space<any>>, %arg2: memref<16x16xi8, #tpu.memory_space<vmem>>, %arg3: memref<1x32x66xf32, #tpu.memory_space<vmem>>, %arg4: memref<1x1x32xf32, #tpu.memory_space<vmem>>, %arg5: memref<16x32xf32, #tpu.memory_space<vmem>>, %arg6: memref<16x32xf32, #tpu.memory_space<vmem>>, %arg7: memref<16x16xf32, #tpu.memory_space<vmem>>, %arg8: memref<!tpu.dma_semaphore, #tpu.memory_space<semaphore_mem>>) attributes {dimension_semantics = [#tpu.dimension_semantics<arbitrary>], iteration_bounds = array<i64: 2>, scalar_prefetch = 0 : i64, scratch_operands = 3 : i64, tpu.core_type = #tpu.core_type<tc>, window_params = [{}, {pipeline_mode = #tpu.pipeline_mode<synchronous>, transform_indices = @transform_1, window_bounds = array<i64: 16, 16>}, {transform_indices = @transform_2, window_bounds = array<i64: 1, 32, 66>}, {transform_indices = @transform_3, window_bounds = array<i64: 1, 1, 32>}, {pipeline_mode = #tpu.pipeline_mode<synchronous>, transform_indices = @transform_4, window_bounds = array<i64: 16, 32>}]} {
    %c0_i32 = arith.constant 0 : i32
    %0 = arith.cmpi eq, %arg0, %c0_i32 : i32
    %1 = arith.extui %0 : i1 to i32
    %c0_i32_0 = arith.constant 0 : i32
    %2 = arith.cmpi ne, %1, %c0_i32_0 : i32
    scf.if %2 {
      tpu.enqueue_dma source(%arg1 : memref<16x32xf32, #tpu.memory_space<any>>) target(%arg6 : memref<16x32xf32, #tpu.memory_space<vmem>>) target_semaphore(%arg8 : memref<!tpu.dma_semaphore, #tpu.memory_space<semaphore_mem>>)
      %c0_24 = arith.constant 0 : index
      %c0_25 = arith.constant 0 : index
      %56 = vector.load %arg2[%c0_24, %c0_25] : memref<16x16xi8, #tpu.memory_space<vmem>>, vector<16x16xi8>
      %57 = arith.sitofp %56 : vector<16x16xi8> to vector<16x16xf32>
      %cst_26 = arith.constant 0.000000e+00 : f32
      %58 = vector.broadcast %cst_26 : f32 to vector<16x16xf32>
      %59 = arith.cmpf ogt, %57, %58 : vector<16x16xf32>
      %cst_27 = arith.constant 0.000000e+00 : f32
      %cst_28 = arith.constant -1.000000e+30 : f32
      %60 = vector.broadcast %cst_27 : f32 to vector<16x16xf32>
      %61 = vector.broadcast %cst_28 : f32 to vector<16x16xf32>
      %62 = arith.select %59, %60, %61 : vector<16x16xi1>, vector<16x16xf32>
      %c0_29 = arith.constant 0 : index
      %c0_30 = arith.constant 0 : index
      %63 = vector.load %arg7[%c0_29, %c0_30] : memref<16x16xf32, #tpu.memory_space<vmem>>, vector<16x16xf32>
      tpu.vector_store %arg7[%c0_29, %c0_30], %62 {strides = array<i32>} : memref<16x16xf32, #tpu.memory_space<vmem>>, vector<16x16xf32>,
      tpu.wait_dma2 semaphore(%arg8 : memref<!tpu.dma_semaphore, #tpu.memory_space<semaphore_mem>>) src(%arg1 : memref<16x32xf32, #tpu.memory_space<any>>) dst(%arg6 : memref<16x32xf32, #tpu.memory_space<vmem>>)
    } else {
    }
    %c0 = arith.constant 0 : index
    %c0_1 = arith.constant 0 : index
    %3 = vector.load %arg6[%c0, %c0_1] : memref<16x32xf32, #tpu.memory_space<vmem>>, vector<16x32xf32>
    %c0_2 = arith.constant 0 : index
    %c0_3 = arith.constant 0 : index
    %c0_4 = arith.constant 0 : index
    %4 = vector.load %arg3[%c0_2, %c0_3, %c0_4] : memref<1x32x66xf32, #tpu.memory_space<vmem>>, vector<1x32x66xf32>
    %5 = vector.shape_cast %4 : vector<1x32x66xf32> to vector<32x66xf32>
    %cst = arith.constant dense<0.000000e+00> : vector<16x66xf32>
    %6 = tpu.matmul %3, %5, %cst {dimension_numbers = #tpu.dot_dimension_numbers<[1], [0], [0], [1], [0, 0, 1, 1], [], []>} : vector<16x32xf32>, vector<32x66xf32>, vector<16x66xf32> -> vector<16x66xf32>
    %7 = vector.extract_strided_slice %6 {offsets = [0, 0], sizes = [16, 32], strides = [1, 1]} : vector<16x66xf32> to vector<16x32xf32>
    %8 = vector.extract_strided_slice %6 {offsets = [0, 32], sizes = [16, 32], strides = [1, 1]} : vector<16x66xf32> to vector<16x32xf32>
    %9 = vector.extract_strided_slice %6 {offsets = [0, 64], sizes = [16, 1], strides = [1, 1]} : vector<16x66xf32> to vector<16x1xf32>
    %10 = vector.extract_strided_slice %6 {offsets = [0, 65], sizes = [16, 1], strides = [1, 1]} : vector<16x66xf32> to vector<16x1xf32>
    %11 = tpu.transpose %10, [1, 0] : vector<16x1xf32> -> vector<1x16xf32>
    %12 = vector.broadcast %9 : vector<16x1xf32> to vector<16x16xf32>
    %13 = vector.broadcast %11 : vector<1x16xf32> to vector<16x16xf32>
    %14 = arith.addf %12, %13 : vector<16x16xf32>
    %cst_5 = arith.constant 0.000000e+00 : f32
    %15 = vector.broadcast %cst_5 : f32 to vector<16x16xf32>
    %16 = arith.cmpf ogt, %14, %15 : vector<16x16xf32>
    %cst_6 = arith.constant 2.000000e-01 : f32
    %17 = vector.broadcast %cst_6 : f32 to vector<16x16xf32>
    %18 = arith.mulf %17, %14 : vector<16x16xf32>
    %19 = arith.select %16, %14, %18 : vector<16x16xi1>, vector<16x16xf32>
    %c0_7 = arith.constant 0 : index
    %c0_8 = arith.constant 0 : index
    %20 = vector.load %arg7[%c0_7, %c0_8] : memref<16x16xf32, #tpu.memory_space<vmem>>, vector<16x16xf32>
    %21 = arith.addf %19, %20 : vector<16x16xf32>
    %cst_9 = arith.constant dense<0xFF800000> : vector<16xf32>
    %22 = vector.multi_reduction <maximumf>, %21, %cst_9 [1] : vector<16x16xf32> to vector<16xf32>
    %23 = vector.shape_cast %22 : vector<16xf32> to vector<16x1xf32>
    %cst_10 = arith.constant -5.000000e+29 : f32
    %24 = vector.broadcast %cst_10 : f32 to vector<16x1xf32>
    %25 = arith.cmpf ogt, %23, %24 : vector<16x1xf32>
    %cst_11 = arith.constant 0.000000e+00 : f32
    %26 = vector.broadcast %cst_11 : f32 to vector<16x1xf32>
    %27 = arith.select %25, %23, %26 : vector<16x1xi1>, vector<16x1xf32>
    %28 = vector.broadcast %27 : vector<16x1xf32> to vector<16x16xf32>
    %29 = arith.subf %21, %28 : vector<16x16xf32>
    %30 = math.exp %29 : vector<16x16xf32>
    %cst_12 = arith.constant dense<0.000000e+00> : vector<16xf32>
    %31 = vector.multi_reduction <add>, %30, %cst_12 [1] : vector<16x16xf32> to vector<16xf32>
    %32 = vector.shape_cast %31 : vector<16xf32> to vector<16x1xf32>
    %cst_13 = arith.constant 0.000000e+00 : f32
    %33 = vector.broadcast %cst_13 : f32 to vector<16x1xf32>
    %34 = arith.cmpf ogt, %32, %33 : vector<16x1xf32>
    %cst_14 = arith.constant 1.000000e+00 : f32
    %35 = vector.broadcast %cst_14 : f32 to vector<16x1xf32>
    %36 = arith.select %34, %32, %35 : vector<16x1xi1>, vector<16x1xf32>
    %37 = tpu.reciprocal %36 {approx = true} : vector<16x1xf32> -> vector<16x1xf32>
    %38 = arith.mulf %36, %37 : vector<16x1xf32>
    %cst_15 = arith.constant 2.000000e+00 : f32
    %39 = vector.broadcast %cst_15 : f32 to vector<16x1xf32>
    %40 = arith.subf %39, %38 : vector<16x1xf32>
    %41 = arith.mulf %37, %40 : vector<16x1xf32>
    %cst_16 = arith.constant dense<0.000000e+00> : vector<16x32xf32>
    %42 = tpu.matmul %30, %7, %cst_16 {dimension_numbers = #tpu.dot_dimension_numbers<[1], [0], [0], [1], [0, 0, 1, 1], [], []>} : vector<16x16xf32>, vector<16x32xf32>, vector<16x32xf32> -> vector<16x32xf32>
    %43 = vector.broadcast %41 : vector<16x1xf32> to vector<16x32xf32>
    %44 = arith.mulf %42, %43 : vector<16x32xf32>
    %45 = arith.addf %44, %8 : vector<16x32xf32>
    %c0_17 = arith.constant 0 : index
    %c0_18 = arith.constant 0 : index
    %c0_19 = arith.constant 0 : index
    %46 = vector.load %arg4[%c0_17, %c0_18, %c0_19] : memref<1x1x32xf32, #tpu.memory_space<vmem>>, vector<1x1x32xf32>
    %47 = vector.shape_cast %46 : vector<1x1x32xf32> to vector<1x32xf32>
    %48 = vector.broadcast %47 : vector<1x32xf32> to vector<16x32xf32>
    %49 = arith.addf %45, %48 : vector<16x32xf32>
    %cst_20 = arith.constant 0.000000e+00 : f32
    %50 = vector.broadcast %cst_20 : f32 to vector<16x32xf32>
    %51 = arith.maximumf %49, %50 : vector<16x32xf32>
    %c0_21 = arith.constant 0 : index
    %c0_22 = arith.constant 0 : index
    %52 = vector.load %arg6[%c0_21, %c0_22] : memref<16x32xf32, #tpu.memory_space<vmem>>, vector<16x32xf32>
    tpu.vector_store %arg6[%c0_21, %c0_22], %51 {strides = array<i32>} : memref<16x32xf32, #tpu.memory_space<vmem>>, vector<16x32xf32>,
    %c1_i32 = arith.constant 1 : i32
    %53 = arith.cmpi eq, %arg0, %c1_i32 : i32
    %54 = arith.extui %53 : i1 to i32
    %c0_i32_23 = arith.constant 0 : i32
    %55 = arith.cmpi ne, %54, %c0_i32_23 : i32
    scf.if %55 {
      %c0_24 = arith.constant 0 : index
      %c0_25 = arith.constant 0 : index
      %56 = vector.load %arg5[%c0_24, %c0_25] : memref<16x32xf32, #tpu.memory_space<vmem>>, vector<16x32xf32>
      tpu.vector_store %arg5[%c0_24, %c0_25], %51 {strides = array<i32>} : memref<16x32xf32, #tpu.memory_space<vmem>>, vector<16x32xf32>,
    } else {
    }
    return
  }
  func.func @transform_1(%arg0: i32) -> (i32, i32) {
    %c0_i32 = arith.constant 0 : i32
    %c0_i32_0 = arith.constant 0 : i32
    %c0_i32_1 = arith.constant 0 : i32
    return %c0_i32, %c0_i32_0 : i32, i32
  }
  func.func @transform_2(%arg0: i32) -> (i32, i32, i32) {
    %c0_i32 = arith.constant 0 : i32
    %c0_i32_0 = arith.constant 0 : i32
    %c0_i32_1 = arith.constant 0 : i32
    return %arg0, %c0_i32, %c0_i32_0 : i32, i32, i32
  }
  func.func @transform_3(%arg0: i32) -> (i32, i32, i32) {
    %c0_i32 = arith.constant 0 : i32
    %c0_i32_0 = arith.constant 0 : i32
    %c0_i32_1 = arith.constant 0 : i32
    return %arg0, %c0_i32, %c0_i32_0 : i32, i32, i32
  }
  func.func @transform_4(%arg0: i32) -> (i32, i32) {
    %c0_i32 = arith.constant 0 : i32
    %c0_i32_0 = arith.constant 0 : i32
    %c0_i32_1 = arith.constant 0 : i32
    return %c0_i32, %c0_i32_0 : i32, i32
  }
}

</mosaic_0001>

<bundles_post_ra>
// kernel: tpu_custom_call.1
= control target key start
LH: loop header
LB: loop body
LE: loop exit
PB: predicated region body
PF: predicated region fallthrough
CT: control target
= control target key end

     0   :  { %9 = vsyncpa [#allocation6], 0  ;;  %s1109_s0 = inlined_call_operand.hbm [shape: f32[16,32], index: 0, kind: input, shape index: {}]   ;;  %s1110_s1 = inlined_call_operand.hbm [shape: s8[16,16], index: 1, kind: input, shape index: {}]   ;;  %s1111_s2 = inlined_call_operand.hbm [shape: f32[2,32,66], index: 2, kind: input, shape index: {}]   ;;  %s1112_s3 = inlined_call_operand.vmem [shape: f32[2,1,32], index: 3, kind: input, shape index: {}]   ;;  %s1113_s4 = inlined_call_operand.hbm [shape: f32[16,32], index: 4, kind: output, shape index: {}]  }
   0x1   :  { %10 = vsyncpa [#allocation9], 0 }
   0x2   :  { %12 = vsyncpa [#allocation9 + $0x1], 0 }
   0x3   :  { %13 = vsyncpa [#allocation7], 0  ;;  %s938_s15 = smov 0   ;;  %s940_s16 = smov 0  }
   0x4   :  { %s942_s17 = smov 0   ;;  %s944_s18 = smov 0  }
   0x5 LB: > { %s957_s19 = sadd.s32 4294967295, %s897_s18   ;;  %p60_p0 = scmp.ne.s32.totalorder %s889_s16, %s885_s15  ;;  %s897_s18 = sphi %s944_s18, %s1129_s18   ;;  %s893_s17 = sphi %s942_s17, %s1128_s17   ;;  %s889_s16 = sphi %s940_s16, %s1127_s16   ;;  %s885_s15 = sphi %s938_s15, %s1126_s15  }
   0x6   : > { %p1114_p1 = scmp.eq.s32.totalorder %s957_s19, 0  ;;  %p622_p2 = scmp.ge.s32.totalorder %s897_s18, 1 }
   0x7   : > { %p118_p3 = scmp.lt.s32.totalorder %s897_s18, 3  ;;  %s899_s22 = smov [#allocation5]  }
   0x8   : > { %p966_p5 = por %p1114_p1, %p60_p0  ;;  %s130_s23 = sshll.u32 %s899_s22, 4  ;;  %s131_s23 = int_to_ptr.vmem [resolvable:$true] %s130_s23 }
   0x9   : > { %p970_p6 = pnand %p622_p2, %p118_p3  ;;  %s983_s25 = sadd.s32 1, %s897_s18  }
   0xa   : > { %s1117_s20 = scalar_select %p966_p5, 1, 0 }
   0xb   : > { %s1118_s21 = scalar_select %p970_p6, 1, 0 }
   0xc   : > { %p686_p7 = pneg %p970_p6  ;;  %s47_s26 = sadd.s32 1, %s893_s17 }
   0xd   : > { %s44_s27 = ssub.s32 %s897_s18, %s983_s25  ;;  %s766_s28 = scalar_lea.vmem %s131_s23, 64 }
   0xe   : > { %p978_p8 = pnand %p686_p7, %p1114_p1  ;;  %p767_p10 = scmp.ne.s32.totalorder %s131_s23, %s766_s28 }
   0xf   : > { %p774_p13 = scmp.lt.s32.totalorder %s131_s23, %s131_s23  ;;  %p775_p0 = scmp.lt.s32.totalorder %s766_s28, %s766_s28 }
  0x10   : > { %p757_p9 = pneg %p978_p8 }
  0x11   : > { %p776_p2 = por %p775_p0, %p774_p13 }
  0x12   : > { %p769_p11 = pnand %p767_p10, %p757_p9 }
  0x14   : > { %p770_p12 = pneg %p769_p11 }
  0x16   : > { %p777_p3 = pnand %p776_p2, %p770_p12 }
  0x18   : > { %780 = shalt.err (!%p777_p3)
}
  0x19   : > { %s900_s29 = smov 32   ;;  %s901_s30 = smov 2  }
  0x1a   : > { %689 = dma.hbm_to_vmem [thread:$0]  (!%p978_p8), %s1110_s1, 64, %s131_s23, [#allocation6], %s900_s29, %s900_s29, %s901_s30  }
  0x1b   : > { %p45_p7 = scmp.eq.s32.totalorder %s44_s27, 0  ;;  %p54_p9 = scmp.ne.s32.totalorder %s893_s17, %s889_s16 }
  0x1c   : > { %p55_p10 = scmp.eq.s32.totalorder %s897_s18, 0  ;;  %p695_p11 = scmp.lt.s32.totalorder %s897_s18, 2 }
  0x1d   : > { %s1000_s7 = scalar_select %p45_p7, %s893_s17, %s47_s26  }
  0x1e   : > { %p56_p12 = por %p55_p10, %p54_p9  ;;  %s144_s8 = sand.u32 1, %s893_s17  }
  0x1f   : > { %s625_s9 = sshll.u32 %s144_s8, 5  ;;  %s643_s10 = sshll.u32 %s897_s18, 9 }
  0x20   : > { %s1007_s13 = scalar_lea.hbm %s1111_s2, %s643_s10  ;;  %s148_s14 = scalar_lea.vmem [#allocation8], %s625_s9 }
  0x21   : > { %s155_s15 = sshll.u32 %s148_s14, 4  ;;  %p1011_p8 = pnand %p695_p11, %p56_p12  ;;  %s1009_s15 = int_to_ptr.vmem [resolvable:$true] %s155_s15 }
  0x22   : > { %s1015_s23 = scalar_lea.sflag [#allocation9], %s144_s8  ;;  %s781_s18 = scalar_lea.hbm %s1007_s13, 512 }
  0x23   : > { %p782_p13 = scmp.ne.s32.totalorder %s1007_s13, %s781_s18  ;;  %p783_p0 = pneg %p1011_p8 }
  0x24   : > { %s786_s27 = scalar_lea.hbm %s1111_s2, 1024  ;;  %p787_p7 = scmp.lt.s32.totalorder %s1007_s13, %s1111_s2 }
  0x25   : > { %p784_p2 = pnand %p783_p0, %p782_p13  ;;  %p788_p9 = scmp.lt.s32.totalorder %s786_s27, %s781_s18 }
  0x27   : > { %p785_p3 = pneg %p784_p2  ;;  %p789_p10 = por %p788_p9, %p787_p7 }
  0x29   : > { %p790_p11 = pnand %p789_p10, %p785_p3 }
  0x2b   : > { %793 = shalt.err (!%p790_p11)
}
  0x2c   : > { %s794_s30 = scalar_lea.vmem %s1009_s15, 512  ;;  %s902_s5 = smov [#allocation8]  }
  0x2d   : > { %p795_p12 = scmp.ne.s32.totalorder %s1009_s15, %s794_s30  ;;  %s799_s6 = sshll.u32 %s902_s5, 4  ;;  %s800_s6 = int_to_ptr.vmem [resolvable:$false] %s799_s6 }
  0x2e   : > { %s801_s8 = scalar_lea.vmem %s800_s6, 1024  ;;  %p802_p2 = scmp.lt.s32.totalorder %s1009_s15, %s800_s6 }
  0x2f   : > { %p797_p4 = pnand %p795_p12, %p783_p0  ;;  %p803_p1 = scmp.lt.s32.totalorder %s801_s8, %s794_s30 }
  0x31   : > { %p798_p13 = pneg %p797_p4  ;;  %p804_p5 = por %p803_p1, %p802_p2 }
  0x33   : > { %p805_p6 = pnand %p804_p5, %p798_p13 }
  0x35   : > { %808 = shalt.err (!%p805_p6)
}
  0x36   : > { %s903_s9 = smov 128   ;;  %s904_s10 = smov 8  }
  0x37   : > { %693 = dma.hbm_to_vmem [thread:$0]  (!%p1011_p8), %s1007_s13, 512, %s1009_s15, %s1015_s23, %s903_s9, %s903_s9, %s904_s10  }
  0x38   : > { %p1121_p0 = scmp.ne.s32.totalorder %s1118_s21, 0 }
  0x39   : > { %p1122_p4 = scmp.eq.s32.totalorder (!%p1121_p0), %s957_s19, 0 }
  0x3a   : > { %173 = sbr.rel (%p1121_p0) target bundleno = 923 (0x39b), region = 32 }
  0x3f   : > { %870 = dma.done.wait (%p1122_p4), [#allocation6], 64   ;;  %p1123_p3 = pmov %p1122_p4 }
  0x40   : > { %s179_s11 = sand.u32 1, %s889_s16   ;;  %p1124_p1 = scmp.ne.s32.totalorder %s1117_s20, 0 }
  0x41   : > { %872 = vsyncadd (%p1123_p3), [#allocation6], 4294967232  ;;  %s630_s12 = sshll.u32 %s179_s11, 5  ;;  %s180_s14 = scalar_lea.sflag [#allocation9], %s179_s11 }
  0x42   : > { %s1043_s18 = scalar_lea.vmem [#allocation8], %s630_s12 }
  0x43   : > { %874 = dma.done.wait (%p1124_p1), %s180_s14, 512  }
  0x44   : > { %876 = vsyncadd (%p1124_p1), %s180_s14, 4294966784  ;;  %p204_p5 = scmp.lt.s32.totalorder %s957_s19, 1  ;;  %p1125_p6 = scmp.ne.s32.totalorder %s957_s19, 0 }
  0x45   : > { %s905_s23 = smov (!%p1125_p6), [#allocation2]  }
  0x46   : > { %s1051_s21 = scalar_select %p204_p5, %s957_s19, 1 }
  0x47   : > { %210 = sbr.rel (%p1125_p6) target bundleno = 88 (0x58), region = 44  ;;  %s218_s24 = sshll.u32 (!%p1125_p6), %s905_s23, 4  ;;  %s219_s24 = int_to_ptr.vmem [resolvable:$true] %s218_s24 }
  0x48   : > { %s206_s22 = scalar_lea.vmem %s1112_s3, %s1051_s21  ;;  %s817_s20 = scalar_lea.vmem (!%p1125_p6), %s219_s24, 256 }
  0x49   : > { %p818_p8 = scmp.ne.s32.totalorder (!%p1125_p6), %s219_s24, %s817_s20  ;;  %p822_p7 = scmp.lt.s32.totalorder (!%p1125_p6), %s219_s24, %s219_s24 }
  0x4a   : > { %p823_p9 = scmp.lt.s32.totalorder (!%p1125_p6), %s817_s20, %s817_s20 }
  0x4c   : > { %v645_v0 = vld [vmem:[#allocation5] sm:$0xf]   ;;  %p824_p10 = por %p823_p9, %p822_p7 }
  0x4d   : > { %v646_v1 = vunpack.c.0.s8 %v645_v0  ;;  %v647_v2 = vunpack.c.1.s8 %v645_v0 }
  0x4e   : > { %p825_p11 = pnand %p824_p10, %p818_p8 }
  0x50   : > { %828 = shalt.err (!%p825_p11)  }
  0x51   : > { %221 = dma.hbm_to_vmem [thread:$0]  %s1109_s0, 256, %s219_s24, [#allocation4]  ;;  %v226_v3 = vcvt.s32.f32 %v646_v1  ;;  %v227_v4 = vcvt.s32.f32 %v647_v2  ;;  %vm232_vm0 = vcmask 130048   ;;  %v906_v5 = vmov -1e+30  }
  0x53   : > { %vm228_vm1 = vcmp.gt.f32.partialorder %v226_v3, 0.0  ;;  %vm229_vm2 = vcmp.gt.f32.partialorder %v227_v4, 0.0 }
  0x54   : > { %v230_v6 = vsel %vm228_vm1, 0.0, %v906_v5  ;;  %v231_v7 = vsel %vm229_vm2, 0.0, %v906_v5 }
  0x55   : > { %233 = vst.msk [vmem:[#allocation3] sm:$0xff] %vm232_vm0, %v230_v6  ;;  %234 = vst.msk [vmem:[#allocation3 + $0x8] sm:$0xff] %vm232_vm0, %v231_v7 }
  0x56   : > { %877 = dma.done.wait [#allocation4], 256 }
  0x57   : > { %878 = vsyncadd [#allocation4], 4294967040 }
  0x58 PF: > { %v243_v8 = vld [vmem:[%s1043_s18 + $0x18] sm:$0xff]  ;;  %v242_v9 = vld [vmem:[%s1043_s18 + $0x10] sm:$0xff]  ;;  %vm244_vm3 = vcmask 261120   ;;  %v241_v11 = vld [vmem:[%s1043_s18 + $0x8] sm:$0xff]  ;;  %v907_v14 = vmov 64   ;;  %s908_s28 = smov 63   ;;  %v374_v19 = vlaneseq }
  0x59   : > { %658 = vmatprep.subr.mxu0 %v243_v8  ;;  %v238_v10 = vld [vmem:[#allocation2] sm:$0xff]  ;;  %v239_v13 = vld [vmem:[#allocation2 + $0x8] sm:$0xff]  ;;  %745 = vset.pattern.permute.xlu1 %v907_v14  ;;  %vm390_vm6 = vcmask 130048   ;;  %s909_s29 = smov 96   ;;  %p637_p12 = scmp.ne.s32.totalorder %s957_s19, 1 }
  0x5a   : > { %659 = vmatpush3.msra.mxu0 %v243_v8  ;;  %666 = vmatprep.mubr.msk.f32.mxu0 %vm244_vm3, %v238_v10  ;;  %v240_v12 = vld [vmem:[%s1043_s18] sm:$0xff]  ;;  %v375_v20 = vshrl.u32 %v374_v19, 7  ;;  %v636_v2 = vld [vmem:[%s206_s22] ss:$0 sm:$0xff] }
  0x5b   : > { %660 = vmatprep.subr.mxu0 %v242_v9 }
  0x5c   : > { %661 = vmatpush3.msra.mxu0 %v242_v9  ;;  %v376_v22 = vsub.s32 0, %v375_v20  ;;  %v387_v28 = vld [vmem:[#allocation3 + $0x8] sm:$0xff]  ;;  %v386_v29 = vld [vmem:[#allocation3] sm:$0xff] }
  0x5d   : > { %662 = vmatprep.subr.mxu0 %v241_v11 }
  0x5e   : > { %663 = vmatpush3.msra.mxu0 %v241_v11 }
  0x5f   : > { %664 = vmatprep.subr.mxu0 %v240_v12 }
  0x60   : > { %665 = vmatpush3.msra.mxu0 %v240_v12 }
  0x61   : > { %667 = vmatmul.mubr.msk.f32.vlgmr.msra.gmra.mxu0 %vm244_vm3, %v239_v13 }
 0x121   : > { %v668_v15 = vpop.f32.mrf.mxu0 }
 0x122   : > { %669 = vmatprep.subr.mxu1 %v668_v15 }
 0x123   : > { %v317_v16 = vpop.f32.mrf.mxu0  ;;  %670 = vmatpush3.msra.mxu1 %v668_v15 }
 0x124   : > { %367 = vperm.xlu1 %745, %v317_v16   ;;  %328 = vrot.lane.b32.xlu0 %v317_v16, %s908_s28 }
 0x125   : > { %671 = vmatprep.subr.mxu1 %v317_v16 }
 0x126   : > { %672 = vmatpush3.msra.mxu1 %v317_v16 }
 0x128   : > { %371 = vperm.xlu1 %745, %v668_v15   ;;  %330 = vrot.lane.b32.xlu0 %v668_v15, %s908_s28 }
 0x196   : > { %v329_v17 = vpop.permute.xlu0 %328 }
 0x197   : > { %334 = vxpose.xlu0.b32.start [1/2] (short) (narrow) %v329_v17, 8 }
 0x19a   : > { %v331_v18 = vpop.permute.xlu0 %330 }
 0x19b   : > { %335 = vxpose.xlu0.b32.end [2/2] (short) (narrow) %v331_v18, 8 }
 0x19f   : > { %v368_v21 = vpop.permute.xlu1 %367 }
 0x1a3   : > { %v372_v25 = vpop.permute.xlu1 %371 }
 0x1c4   : > { %746 = vset.pattern.permute.xlu0 %v907_v14 }
 0x213   : > { %v350_v23 = vpop.trf.xlu0 }
 0x214   : > { %v377_v24 = vrot.slane %v350_v23, %v376_v22 }
 0x216   : > { %v378_v26 = vadd.f32 %v377_v24, %v368_v21  ;;  %v379_v27 = vadd.f32 %v377_v24, %v372_v25 }
 0x218   : > { %v382_v30 = vmul.f32 0.2, %v378_v26  ;;  %v383_v31 = vmul.f32 0.2, %v379_v27  ;;  %vm381_vm4 = vcmp.gt.f32.partialorder %v379_v27, 0.0  ;;  %vm380_vm5 = vcmp.gt.f32.partialorder %v378_v26, 0.0 }
 0x21a   : > { %v385_v32 = vsel %vm381_vm4, %v379_v27, %v383_v31  ;;  %v384_v33 = vsel %vm380_vm5, %v378_v26, %v382_v30 }
 0x21b   : > { %v389_v34 = vadd.f32 %v387_v28, %v385_v32  ;;  %v388_v35 = vadd.f32 %v386_v29, %v384_v33 }
 0x21d   : > { %v394_v36 = vsel %vm390_vm6, %v389_v34, -inf  ;;  %v391_v37 = vsel %vm390_vm6, %v388_v35, -inf }
 0x21e   : > { %395 = vmax.xlane.f32.xlu0 %v394_v36  ;;  %392 = vmax.xlane.f32.xlu1 %v391_v37 }
 0x22f   : > { %508 = vrot.lane.b32.xlu1 %v317_v16, %s909_s29 }
 0x2a7   : > { %v396_v38 = vpop.xlane.xlu0 %395  ;;  %v393_v39 = vpop.xlane.xlu1 %392 }
 0x2a8   : > { %vm398_vm7 = vcmp.gt.f32.partialorder %v396_v38, -5e+29  ;;  %vm397_vm8 = vcmp.gt.f32.partialorder %v393_v39, -5e+29 }
 0x2a9   : > { %v400_v40 = vsel %vm398_vm7, %v396_v38, 0.0  ;;  %v399_v41 = vsel %vm397_vm8, %v393_v39, 0.0 }
 0x2aa   : > { %v402_v42 = vsub.f32 %v389_v34, %v400_v40  ;;  %v401_v43 = vsub.f32 %v388_v35, %v399_v41 }
 0x2ab   : > { %v509_v50 = vpop.permute.xlu1 %508 }
 0x2ac   : > { %v405_v44 = vmul.f32 1.442695, %v402_v42  ;;  %v403_v45 = vmul.f32 1.442695, %v401_v43 }
 0x2ae   : > { %747 = vpow2.f32 %v405_v44 }
 0x2af   : > { %749 = vpow2.f32 %v403_v45 }
 0x2bb   : > { %v748_v46 = vpop.eup %747 }
 0x2bc   : > { %v750_v47 = vpop.eup %749  ;;  %v410_v49 = vsel %vm390_vm6, %v748_v46, 0.0 }
 0x2bd   : > { %673 = vmatprep.mubr.msk.f32.mxu1 %vm390_vm6, %v750_v47  ;;  %v407_v48 = vsel %vm390_vm6, %v750_v47, 0.0 }
 0x2be   : > { %408 = vadd.xlane.f32.xlu1 %v407_v48  ;;  %674 = vmatmul.mubr.msk.f32.vlgmr.msra.gmra.mxu1 %vm390_vm6, %v748_v46 }
 0x2c2   : > { %411 = vadd.xlane.f32.xlu1 %v410_v49 }
 0x2d3   : > { %510 = vrot.lane.b32.xlu1 %v668_v15, %s909_s29 }
 0x347   : > { %v409_v51 = vpop.xlane.xlu1 %408 }
 0x348   : > { %vm413_vm10 = vcmp.gt.f32.partialorder %v409_v51, 0.0 }
 0x349   : > { %v415_v54 = vsel %vm413_vm10, %v409_v51, 1.0 }
 0x34b   : > { %v412_v52 = vpop.xlane.xlu1 %411 }
 0x34c   : > { %vm414_vm9 = vcmp.gt.f32.partialorder %v412_v52, 0.0 }
 0x34d   : > { %v416_v53 = vsel %vm414_vm9, %v412_v52, 1.0 }
 0x34e   : > { %751 = vrcp.f32 %v416_v53 }
 0x34f   : > { %753 = vrcp.f32 %v415_v54  ;;  %v511_v1 = vpop.permute.xlu1 %510 }
 0x35b   : > { %v752_v55 = vpop.eup %751 }
 0x35c   : > { %v754_v56 = vpop.eup %753  ;;  %v420_v57 = vmul.f32 %v752_v55, %v416_v53 }
 0x35d   : > { %v419_v58 = vmul.f32 %v754_v56, %v415_v54 }
 0x35e   : > { %v422_v59 = vsub.f32 2.0, %v420_v57 }
 0x35f   : > { %v421_v60 = vsub.f32 2.0, %v419_v58 }
 0x360   : > { %v424_v61 = vmul.f32 %v752_v55, %v422_v59 }
 0x361   : > { %v423_v0 = vmul.f32 %v754_v56, %v421_v60 }
 0x37e   : > { %v675_v62 = vpop.f32.mrf.mxu1 }
 0x37f   : > { %v507_v63 = vmul.f32 %v675_v62, %v424_v61 }
 0x380   : > { %v497_v3 = vpop.f32.mrf.mxu1 }
 0x381   : > { %v515_v4 = vadd.f32 %v511_v1, %v507_v63  ;;  %v506_v5 = vmul.f32 %v497_v3, %v423_v0 }
 0x383   : > { %v524_v6 = vadd.f32 %v636_v2, %v515_v4  ;;  %v514_v7 = vadd.f32 %v509_v50, %v506_v5 }
 0x385   : > { %v526_v8 = vmax.f32 %v524_v6, 0.0  ;;  %v523_v9 = vadd.f32 %v636_v2, %v514_v7  ;;  %532 = sbr.rel (%p637_p12) target bundleno = 907 (0x38b), region = 52 }
 0x387   : > { %528 = vst.msk [vmem:[#allocation2 + $0x8] sm:$0xff] %vm244_vm3, %v526_v8  ;;  %v525_v10 = vmax.f32 %v523_v9, 0.0 }
 0x389   : > { %527 = vst.msk [vmem:[#allocation2] sm:$0xff] %vm244_vm3, %v525_v10 }
 0x38a   : > { %533 = vst.msk [vmem:[#allocation10] sm:$0xff] %vm244_vm3, %v525_v10  ;;  %534 = vst.msk [vmem:[#allocation10 + $0x8] sm:$0xff] %vm244_vm3, %v526_v8 }
 0x38b PF: > { %p697_p13 = scmp.eq.s32.totalorder %s957_s19, 1  ;;  %s910_s6 = smov [#allocation10]  }
 0x38c   : > { %s541_s8 = sshll.u32 %s910_s6, 4  ;;  %s542_s8 = int_to_ptr.vmem [resolvable:$true] %s541_s8 }
 0x38d   : > { %s829_s9 = scalar_lea.vmem %s542_s8, 256  ;;  %p836_p3 = scmp.lt.s32.totalorder %s542_s8, %s542_s8 }
 0x38e   : > { %p830_p2 = scmp.ne.s32.totalorder %s542_s8, %s829_s9  ;;  %p837_p1 = scmp.lt.s32.totalorder %s829_s9, %s829_s9 }
 0x390   : > { %p831_p0 = pnand %p830_p2, %p697_p13  ;;  %p838_p5 = por %p837_p1, %p836_p3 }
 0x392   : > { %p832_p4 = pneg %p831_p0 }
 0x394   : > { %p839_p6 = pnand %p838_p5, %p832_p4 }
 0x396   : > { %842 = shalt.err (!%p839_p6)
}
 0x397   : > { %s911_s10 = smov 128   ;;  %s912_s11 = smov 8  }
 0x398   : > { %683 = dma.vmem_to_hbm [thread:$0]  (%p697_p13), %s542_s8, 256, %s1113_s4, [#allocation7], %s911_s10, %s911_s10, %s912_s11  }
 0x399   : > { %880 = dma.done.wait (%p697_p13), [#allocation7], 256  }
 0x39a   : > { %882 = vsyncadd (%p697_p13), [#allocation7], 4294967040 }
 0x39b PF: > { %p16_p8 = scmp.ge.s32.totalorder %s983_s25, 4   ;;  %s1126_s15 = smov %s889_s16 }
 0x39c   : > { %s1127_s16 = smov %s893_s17  ;;  %s1128_s17 = smov %s1000_s7 }
 0x39d   : > { %s1129_s18 = smov %s983_s25  ;;  %18 = sbr.rel (!%p16_p8) target bundleno = 5 (0x5), region = 89 }
 0x3a2   :  { %557 = vsyncpa [#allocation6], 1 }
 0x3a3   :  { %559 = vsyncpa [#allocation6 + $0x1], 1 }
 0x3a4   :  { %560 = vsyncpa [#allocation9], 1 }
 0x3a5   :  { %562 = vsyncpa [#allocation9 + $0x1], 1 }
 0x3a6   :  { %563 = vsyncpa [#allocation7], 1 }
 0x3a7   :  { %565 = vsyncpa [#allocation7 + $0x1], 1 }
 0x3a8   :  { %566 = vsyncmov [#allocation4] }
 0x3ab   :  { %s567_s19 = vpop.sfrf %566 }
 0x3ac   :  { %p642_p7 = scmp.ne.s32.totalorder %s567_s19, 0 }
 0x3ae   :  { %571 = shalt.err (%p642_p7)  }

</bundles_post_ra>
